<compile_context>
chip_gen: v7x
topology: tpu7x:2x2x1
jax: 0.10.0
libtpu: 0.0.40
codegen_flags: <defaults>
</compile_context>

<pallas_src>
import math

import jax
import jax.numpy as jnp
from jax.experimental import pallas as pl
from jax.experimental.pallas import tpu as pltpu

LANES = 128
SUBLANES = 8


def _cdiv(a, b):
    return -(-a // b)


def _yolo_loss_kernel(w_ref, p_ref, t_ref, o_ref, acc_ref):
    # w_ref        : (tile_rows, 128) f32 VMEM-resident channel weights
    # p_ref, t_ref : (tile_rows, 128) streamed input blocks (any float dtype)
    # o_ref        : (1, 8, 128) per-slice partial-sum output block
    # acc_ref      : (8, 128) f32 VMEM running accumulator (per core)
    i = pl.program_id(1)                      # reduction tile index ("arbitrary")

    @pl.when(i == 0)
    def _init():
        acc_ref[...] = jnp.zeros_like(acc_ref)

    # In-kernel upcast (no host-side f32 copy of the inputs).
    diff = p_ref[...].astype(jnp.float32) - t_ref[...].astype(jnp.float32)
    sq = diff * diff * w_ref[...]

    # Reduce the leading (sublane-tiled) axis with pure vreg adds; keep a
    # vreg-shaped (8,128) running partial (no cross-lane XLU reduce per step).
    tile_rows = p_ref.shape[0]
    acc_ref[...] += sq.reshape(tile_rows // SUBLANES, SUBLANES, LANES).sum(axis=0)

    @pl.when(i == pl.num_programs(1) - 1)
    def _finalize():
        o_ref[0] = acc_ref[...]


def yolo_loss_pallas(predictions, target, S=7, B=1, C=5,
                     lambda_coord=5.0, lambda_noobj=0.5,
                     *, target_tile_rows=1024, num_slices=2):
    """predictions, target: (N, S, S, 5*B + C) floats. Returns scalar f32."""
    assert predictions.shape == target.shape
    D = predictions.shape[-1]
    assert D == 5 * B + C
    # TODO(synk): lambda_noobj is accepted but unused — matches the reference
    # forward, which never uses it.

    p = predictions.reshape(-1)
    t = target.reshape(-1)
    L = p.shape[0]

    # Tile rows: multiple of lcm(8, D / gcd(D, 128)) so that D divides the
    # tile element count (-> one reusable weight tile), sized adaptively
    # between that base and ~target_tile_rows (big tiles amortize the
    # ~0.35us/step overhead; small tiles avoid useless padding on tiny inputs).
    period = D // math.gcd(D, LANES)
    base = (SUBLANES * period) // math.gcd(SUBLANES, period)   # lcm(8, period)
    cap = _cdiv(target_tile_rows, base) * base

    rows_needed = _cdiv(L, LANES)
    rows_per_slice = _cdiv(rows_needed, num_slices)
    tr = max(base, min(cap, _cdiv(rows_per_slice, base) * base))

    tile_elems = tr * LANES
    chunk = num_slices * tile_elems
    Lp = _cdiv(L, chunk) * chunk
    pad = Lp - L
    if pad:
        # Padded elements are zero in both inputs -> diff == 0 -> contribute 0.
        p = jnp.pad(p, (0, pad))
        t = jnp.pad(t, (0, pad))

    R = Lp // LANES
    tiles_per_slice = (R // tr) // num_slices

    p2 = p.reshape(R, LANES)
    t2 = t.reshape(R, LANES)

    # Per-channel weight tile; (tr*128) % D == 0 so every tile starts at a
    # flat offset that is a multiple of D and this single tile is exact for
    # all grid steps.
    ch = jnp.arange(tile_elems, dtype=jnp.int32) % D
    w = jnp.where(ch < 2, jnp.float32(lambda_coord),
                  jnp.where(ch < 4, jnp.float32(0.0), jnp.float32(1.0)))
    w2 = w.reshape(tr, LANES)

    partials = pl.pallas_call(
        _yolo_loss_kernel,
        out_shape=jax.ShapeDtypeStruct((num_slices, SUBLANES, LANES), jnp.float32),
        grid=(num_slices, tiles_per_slice),
        in_specs=[
            # Constant block index -> fetched once, stays VMEM-resident.
            pl.BlockSpec((tr, LANES), lambda c, i: (0, 0)),
            pl.BlockSpec((tr, LANES), lambda c, i: (c * tiles_per_slice + i, 0)),
            pl.BlockSpec((tr, LANES), lambda c, i: (c * tiles_per_slice + i, 0)),
        ],
        out_specs=pl.BlockSpec((1, SUBLANES, LANES), lambda c, i: (c, 0, 0)),
        scratch_shapes=[pltpu.VMEM((SUBLANES, LANES), jnp.float32)],
        compiler_params=pltpu.CompilerParams(
            dimension_semantics=("parallel", "arbitrary")),
    )(w2, p2, t2)

    return jnp.sum(partials)


def yolo_loss_ref(predictions, target, lambda_coord=5.0):
    predictions = predictions.astype(jnp.float32)
    target = target.astype(jnp.float32)
    coord = jnp.sum((predictions[..., 0:2] - target[..., 0:2]) ** 2)
    conf = jnp.sum((predictions[..., 4] - target[..., 4]) ** 2)
    cls = jnp.sum((predictions[..., 5:] - target[..., 5:]) ** 2)
    return lambda_coord * coord + conf + cls


if __name__ == "__main__":
    S, B, C = 7, 1, 5
    N = 2
    D = 5 * B + C  # 10
    key = jax.random.PRNGKey(0)
    kp, kt = jax.random.split(key)
    predictions = jax.random.normal(kp, (N, S, S, D), jnp.float32)
    target = jax.random.normal(kt, (N, S, S, D), jnp.float32)

    out = yolo_loss_pallas(predictions, target, S=S, B=B, C=C)
    out = jax.block_until_ready(out)

    ref = yolo_loss_ref(predictions, target)
    assert jnp.allclose(out, ref, rtol=1e-5, atol=1e-4), (out, ref)
    print("KERNEL_OK")
</pallas_src>

<mosaic_0001>
module attributes {stable_mosaic.version = 11 : i64} {
  func.func @_yolo_loss_kernel(%arg0: i32, %arg1: i32, %arg2: memref<40x128xf32, #tpu.memory_space<vmem>>, %arg3: memref<40x128xf32, #tpu.memory_space<vmem>>, %arg4: memref<40x128xf32, #tpu.memory_space<vmem>>, %arg5: memref<1x8x128xf32, #tpu.memory_space<vmem>>, %arg6: memref<8x128xf32, #tpu.memory_space<vmem>>) attributes {dimension_semantics = [#tpu.dimension_semantics<parallel>, #tpu.dimension_semantics<arbitrary>], iteration_bounds = array<i64: 2, 1>, scalar_prefetch = 0 : i64, scratch_operands = 1 : i64, tpu.core_type = #tpu.core_type<tc>, window_params = [{pipeline_mode = #tpu.pipeline_mode<synchronous>, transform_indices = @transform_0, window_bounds = array<i64: 40, 128>}, {transform_indices = @transform_1, window_bounds = array<i64: 40, 128>}, {transform_indices = @transform_2, window_bounds = array<i64: 40, 128>}, {transform_indices = @transform_3, window_bounds = array<i64: 1, 8, 128>}]} {
    %c0_i32 = arith.constant 0 : i32
    %0 = arith.cmpi eq, %arg1, %c0_i32 : i32
    %1 = arith.extui %0 : i1 to i32
    %c0_i32_0 = arith.constant 0 : i32
    %2 = arith.cmpi ne, %1, %c0_i32_0 : i32
    scf.if %2 {
      %cst_12 = arith.constant 0.000000e+00 : f32
      %17 = vector.broadcast %cst_12 : f32 to vector<8x128xf32>
      %c0_13 = arith.constant 0 : index
      %c0_14 = arith.constant 0 : index
      %18 = vector.load %arg6[%c0_13, %c0_14] : memref<8x128xf32, #tpu.memory_space<vmem>>, vector<8x128xf32>
      tpu.vector_store %arg6[%c0_13, %c0_14], %17 {strides = array<i32>} : memref<8x128xf32, #tpu.memory_space<vmem>>, vector<8x128xf32>,
    } else {
    }
    %c0 = arith.constant 0 : index
    %c0_1 = arith.constant 0 : index
    %3 = vector.load %arg3[%c0, %c0_1] : memref<40x128xf32, #tpu.memory_space<vmem>>, vector<40x128xf32>
    %c0_2 = arith.constant 0 : index
    %c0_3 = arith.constant 0 : index
    %4 = vector.load %arg4[%c0_2, %c0_3] : memref<40x128xf32, #tpu.memory_space<vmem>>, vector<40x128xf32>
    %5 = arith.subf %3, %4 : vector<40x128xf32>
    %6 = arith.mulf %5, %5 : vector<40x128xf32>
    %c0_4 = arith.constant 0 : index
    %c0_5 = arith.constant 0 : index
    %7 = vector.load %arg2[%c0_4, %c0_5] : memref<40x128xf32, #tpu.memory_space<vmem>>, vector<40x128xf32>
    %8 = arith.mulf %6, %7 : vector<40x128xf32>
    %c0_6 = arith.constant 0 : index
    %c0_7 = arith.constant 0 : index
    %9 = vector.load %arg6[%c0_6, %c0_7] : memref<8x128xf32, #tpu.memory_space<vmem>>, vector<8x128xf32>
    %10 = vector.shape_cast %8 : vector<40x128xf32> to vector<5x8x128xf32>
    %cst = arith.constant dense<0.000000e+00> : vector<8x128xf32>
    %11 = vector.multi_reduction <add>, %10, %cst [0] : vector<5x8x128xf32> to vector<8x128xf32>
    %12 = arith.addf %9, %11 : vector<8x128xf32>
    %c0_8 = arith.constant 0 : index
    %c0_9 = arith.constant 0 : index
    %13 = vector.load %arg6[%c0_8, %c0_9] : memref<8x128xf32, #tpu.memory_space<vmem>>, vector<8x128xf32>
    tpu.vector_store %arg6[%c0_8, %c0_9], %12 {strides = array<i32>} : memref<8x128xf32, #tpu.memory_space<vmem>>, vector<8x128xf32>,
    %c0_i32_10 = arith.constant 0 : i32
    %14 = arith.cmpi eq, %arg1, %c0_i32_10 : i32
    %15 = arith.extui %14 : i1 to i32
    %c0_i32_11 = arith.constant 0 : i32
    %16 = arith.cmpi ne, %15, %c0_i32_11 : i32
    scf.if %16 {
      %c0_12 = arith.constant 0 : index
      %c0_13 = arith.constant 0 : index
      %17 = vector.load %arg6[%c0_12, %c0_13] : memref<8x128xf32, #tpu.memory_space<vmem>>, vector<8x128xf32>
      %c0_14 = arith.constant 0 : index
      %c0_15 = arith.constant 0 : index
      %c0_16 = arith.constant 0 : index
      %18 = vector.load %arg5[%c0_14, %c0_15, %c0_16] : memref<1x8x128xf32, #tpu.memory_space<vmem>>, vector<1x8x128xf32>
      %19 = vector.shape_cast %18 : vector<1x8x128xf32> to vector<8x128xf32>
      %20 = vector.shape_cast %17 : vector<8x128xf32> to vector<1x8x128xf32>
      tpu.vector_store %arg5[%c0_14, %c0_15, %c0_16], %20 {strides = array<i32>} : memref<1x8x128xf32, #tpu.memory_space<vmem>>, vector<1x8x128xf32>,
    } else {
    }
    return
  }
  func.func @transform_0(%arg0: i32, %arg1: i32) -> (i32, i32) {
    %c0_i32 = arith.constant 0 : i32
    %c0_i32_0 = arith.constant 0 : i32
    %c0_i32_1 = arith.constant 0 : i32
    return %c0_i32, %c0_i32_0 : i32, i32
  }
  func.func @transform_1(%arg0: i32, %arg1: i32) -> (i32, i32) {
    %c1_i32 = arith.constant 1 : i32
    %0 = arith.muli %arg0, %c1_i32 : i32
    %1 = arith.addi %0, %arg1 : i32
    %c0_i32 = arith.constant 0 : i32
    %c0_i32_0 = arith.constant 0 : i32
    return %1, %c0_i32 : i32, i32
  }
  func.func @transform_2(%arg0: i32, %arg1: i32) -> (i32, i32) {
    %c1_i32 = arith.constant 1 : i32
    %0 = arith.muli %arg0, %c1_i32 : i32
    %1 = arith.addi %0, %arg1 : i32
    %c0_i32 = arith.constant 0 : i32
    %c0_i32_0 = arith.constant 0 : i32
    return %1, %c0_i32 : i32, i32
  }
  func.func @transform_3(%arg0: i32, %arg1: i32) -> (i32, i32, i32) {
    %c0_i32 = arith.constant 0 : i32
    %c0_i32_0 = arith.constant 0 : i32
    %c0_i32_1 = arith.constant 0 : i32
    return %arg0, %c0_i32, %c0_i32_0 : i32, i32, i32
  }
}

</mosaic_0001>

<bundles_post_ra>
// kernel: tpu_custom_call.1
= control target key start
LH: loop header
LB: loop body
LE: loop exit
PB: predicated region body
PF: predicated region fallthrough
CT: control target
= control target key end

     0   :  { %s1005_s0 = inlined_call_operand.hbm [shape: f32[40,128], index: 0, kind: input, shape index: {}]   ;;  %s1006_s1 = inlined_call_operand.hbm [shape: f32[80,128], index: 1, kind: input, shape index: {}]   ;;  %s1007_s2 = inlined_call_operand.hbm [shape: f32[80,128], index: 2, kind: input, shape index: {}]   ;;  %s1008_s3 = inlined_call_operand.hbm [shape: f32[2,8,128], index: 3, kind: output, shape index: {}]  }
   0x1   :  { %1015 = sst [smem:[#allocation13_spill]] %s1006_s1 }
   0x2   :  { %8 = vsyncpa [#allocation4], 0 }
   0x3   :  { %9 = vsyncpa [#allocation7], 0 }
   0x4   :  { %11 = vsyncpa [#allocation7 + $0x1], 0 }
   0x5   :  { %12 = vsyncpa [#allocation5], 0 }
   0x6   :  { %14 = vsyncpa [#allocation5 + $0x1], 0  ;;  %s737_s12 = smov 0   ;;  %s739_s13 = smov 0  }
   0x7   :  { %s741_s14 = smov 0   ;;  %s743_s15 = smov 0  }
   0x8   :  { %s745_s16 = smov 0   ;;  %s747_s17 = smov 0  }
   0x9 LB: > { %s32_s18 = sadd.s32 1, %s705_s16  ;;  %s62_s19 = sadd.s32 1, %s697_s14  ;;  %s709_s17 = sphi %s747_s17, %s20_s17   ;;  %s705_s16 = sphi %s745_s16, %s1035_s16   ;;  %s701_s15 = sphi %s743_s15, %s1034_s15   ;;  %s697_s14 = sphi %s741_s14, %s1033_s14   ;;  %s693_s13 = sphi %s739_s13, %s1032_s13   ;;  %s689_s12 = sphi %s737_s12, %s1031_s12  }
   0xa   : > { %p34_p0 = scmp.ge.s32.totalorder %s32_s18, 2  ;;  %p69_p1 = scmp.ne.s32.totalorder %s697_s14, %s693_s13 }
   0xb   : > { %p70_p2 = scmp.eq.s32.totalorder %s709_s17, 0  ;;  %p481_p6 = scmp.lt.s32.totalorder %s709_s17, 2 }
   0xc   : > { %s1037_s18 = smov (%p34_p0, %s32_s18), 0  ;;  %s166_s21 = sand.u32 1, %s709_s17  }
   0xd   : > { %p71_p3 = por %p70_p2, %p69_p1  ;;  %s59_s20 = ssub.s32 %s705_s16, %s1037_s18 }
   0xe   : > { %p60_p5 = scmp.eq.s32.totalorder %s59_s20, 0  ;;  %s168_s22 = sand.u32 1, %s697_s14  }
   0xf   : > { %s786_s24 = smul.u32 40, %s168_s22  ;;  %p789_p7 = pnand %p481_p6, %p71_p3 }
  0x10   : > { %s784_s23 = scalar_select %p60_p5, %s697_s14, %s62_s19  }
  0x11   : > { %s450_s25 = smul.u32 640, %s705_s16  ;;  %s1017_s1 = sld [smem:[#allocation13_spill]] }
  0x12   : > { %s170_s30 = scalar_lea.vmem [#allocation6], %s786_s24  ;;  %s803_s5 = scalar_lea.sflag [#allocation7], %s166_s21 }
  0x13   : > { %s178_s4 = sshll.u32 %s170_s30, 4  ;;  %p537_p9 = pneg %p789_p7  ;;  %s801_s4 = int_to_ptr.vmem [resolvable:$true] %s178_s4 }
  0x17   : > { %s798_s29 = scalar_lea.hbm %s1017_s1, %s450_s25  ;;  %s540_s9 = scalar_lea.hbm %s1017_s1, 1280 }
  0x18   : > { %s535_s6 = scalar_lea.hbm %s798_s29, 640  ;;  %p541_p12 = scmp.lt.u32.totalorder %s798_s29, %s1017_s1 }
  0x19   : > { %p536_p8 = scmp.ne.s32.totalorder %s798_s29, %s535_s6  ;;  %p542_p13 = scmp.lt.u32.totalorder %s540_s9, %s535_s6 }
  0x1a   : > { %p544_p2 = scmp.lt.u32.totalorder %s535_s6, %s798_s29 }
  0x1b   : > { %p538_p10 = pnand %p537_p9, %p536_p8  ;;  %p543_p0 = por %p542_p13, %p541_p12 }
  0x1d   : > { %p539_p11 = pneg %p538_p10  ;;  %p545_p3 = por %p544_p2, %p543_p0 }
  0x1f   : > { %p546_p5 = pnand %p545_p3, %p539_p11 }
  0x21   : > { %549 = shalt.err (!%p546_p5)
}
  0x22   : > { %s550_s19 = scalar_lea.vmem %s801_s4, 640  ;;  %s711_s20 = smov [#allocation6]  }
  0x23   : > { %p551_p6 = scmp.ne.s32.totalorder %s801_s4, %s550_s19  ;;  %s555_s21 = sshll.u32 %s711_s20, 4  ;;  %s556_s21 = int_to_ptr.vmem [resolvable:$false] %s555_s21 }
  0x24   : > { %s557_s22 = scalar_lea.vmem %s556_s21, 1280  ;;  %p558_p4 = scmp.lt.s32.totalorder %s801_s4, %s556_s21 }
  0x25   : > { %p553_p8 = pnand %p551_p6, %p537_p9  ;;  %p559_p12 = scmp.lt.s32.totalorder %s557_s22, %s550_s19 }
  0x27   : > { %p554_p10 = pneg %p553_p8  ;;  %p560_p13 = por %p559_p12, %p558_p4 }
  0x29   : > { %p561_p0 = pnand %p560_p13, %p554_p10 }
  0x2b   : > { %564 = shalt.err (!%p561_p0)
}
  0x2c   : > { %s1009_s27 = smov 128   ;;  %s713_s28 = smov 8  }
  0x2d   : > { %472 = dma.hbm_to_vmem [thread:$0]  (!%p789_p7), %s798_s29, 640, %s801_s4, %s803_s5, %s1009_s27, %s1009_s27, %s713_s28  }
  0x2e   : > { %s835_s30 = sadd.s32 4294967295, %s709_s17   ;;  %s437_s6 = sadd.s32 4294967294, %s709_s17  }
  0x2f   : > { %p75_p4 = scmp.ne.s32.totalorder %s693_s13, %s689_s12  ;;  %p1011_p11 = scmp.eq.s32.totalorder %s835_s30, 0 }
  0x30   : > { %p127_p2 = scmp.eq.s32.totalorder %s835_s30, 1  ;;  %p133_p3 = scmp.eq.s32.totalorder %s437_s6, 1 }
  0x31   : > { %p438_p5 = scmp.ge.s32.totalorder %s709_s17, 1  ;;  %p845_p6 = por %p1011_p11, %p75_p4 }
  0x32   : > { %p852_p8 = por %p127_p2, %p69_p1  ;;  %p856_p10 = por %p133_p3, %p75_p4 }
  0x33   : > { %s1018_s7 = scalar_select %p845_p6, 1, 0 }
  0x34   : > { %s1019_s29 = scalar_select %p852_p8, 1, 0 }
  0x35   : > { %s1020_s4 = scalar_select %p856_p10, 1, 0 }
  0x36   : > { %p140_p12 = scmp.lt.s32.totalorder %s709_s17, 3  ;;  %s714_s9 = smov [#allocation3]  }
  0x37   : > { %s152_s10 = sshll.u32 %s714_s9, 4  ;;  %s872_s20 = scalar_lea.hbm %s1007_s2, %s450_s25  ;;  %s874_s10 = int_to_ptr.vmem [resolvable:$true] %s152_s10 }
  0x38   : > { %p861_p13 = pnand %p438_p5, %p140_p12  ;;  %s192_s21 = scalar_lea.vmem [#allocation8], %s786_s24 }
  0x39   : > { %s200_s22 = sshll.u32 %s192_s21, 4  ;;  %s565_s9 = scalar_lea.hbm %s872_s20, 640  ;;  %s883_s22 = int_to_ptr.vmem [resolvable:$true] %s200_s22 }
  0x3a   : > { %s1021_s8 = scalar_select %p861_p13, 1, 0 }
  0x3b   : > { %p465_p0 = pneg %p861_p13  ;;  %p566_p4 = scmp.ne.s32.totalorder %s872_s20, %s565_s9 }
  0x3c   : > { %s570_s19 = scalar_lea.hbm %s1007_s2, 1280  ;;  %p571_p5 = scmp.lt.u32.totalorder %s872_s20, %s1007_s2 }
  0x3d   : > { %p879_p1 = pnand %p465_p0, %p1011_p11  ;;  %p568_p2 = pnand %p566_p4, %p537_p9 }
  0x3e   : > { %p572_p12 = scmp.lt.u32.totalorder %s570_s19, %s565_s9  ;;  %p574_p11 = scmp.lt.u32.totalorder %s565_s9, %s872_s20 }
  0x3f   : > { %p569_p3 = pneg %p568_p2 }
  0x40   : > { %p573_p0 = por %p572_p12, %p571_p5 }
  0x42   : > { %p575_p10 = por %p574_p11, %p573_p0 }
  0x44   : > { %p576_p8 = pnand %p575_p10, %p569_p3 }
  0x46   : > { %579 = shalt.err (!%p576_p8)
}
  0x47   : > { %s580_s21 = scalar_lea.vmem %s883_s22, 640  ;;  %s715_s25 = smov [#allocation8]  }
  0x48   : > { %p581_p4 = scmp.ne.s32.totalorder %s883_s22, %s580_s21  ;;  %s585_s11 = sshll.u32 %s715_s25, 4  ;;  %s586_s11 = int_to_ptr.vmem [resolvable:$false] %s585_s11 }
  0x49   : > { %s587_s27 = scalar_lea.vmem %s586_s11, 1280  ;;  %p588_p13 = scmp.lt.s32.totalorder %s883_s22, %s586_s11 }
  0x4a   : > { %p583_p2 = pnand %p581_p4, %p537_p9  ;;  %p589_p5 = scmp.lt.s32.totalorder %s587_s27, %s580_s21 }
  0x4c   : > { %p584_p6 = pneg %p583_p2  ;;  %p590_p12 = por %p589_p5, %p588_p13 }
  0x4e   : > { %p591_p11 = pnand %p590_p12, %p584_p6 }
  0x50   : > { %594 = shalt.err (!%p591_p11)
}
  0x51   : > { %s1023_s9 = smov 128   ;;  %s595_s25 = scalar_lea.hbm %s1005_s0, 640 }
  0x52   : > { %475 = dma.hbm_to_vmem [thread:$0]  (!%p789_p7), %s872_s20, 640, %s883_s22, %s803_s5, %s1023_s9, %s1023_s9, %s713_s28  }
  0x53   : > { %p596_p9 = scmp.ne.s32.totalorder %s1005_s0, %s595_s25  ;;  %p597_p6 = pneg %p879_p1 }
  0x54   : > { %p602_p13 = scmp.lt.u32.totalorder %s595_s25, %s1005_s0 }
  0x55   : > { %p598_p8 = pnand %p597_p6, %p596_p9 }
  0x57   : > { %p599_p10 = pneg %p598_p8 }
  0x59   : > { %p604_p3 = pnand %p602_p13, %p599_p10 }
  0x5b   : > { %607 = shalt.err (!%p604_p3)
}
  0x5c   : > { %s608_s5 = scalar_lea.vmem %s874_s10, 640  ;;  %p616_p2 = scmp.lt.s32.totalorder %s874_s10, %s874_s10 }
  0x5d   : > { %p609_p7 = scmp.ne.s32.totalorder %s874_s10, %s608_s5  ;;  %p617_p5 = scmp.lt.s32.totalorder %s608_s5, %s608_s5 }
  0x5f   : > { %p611_p0 = pnand %p609_p7, %p597_p6  ;;  %p618_p12 = por %p617_p5, %p616_p2 }
  0x61   : > { %p612_p4 = pneg %p611_p0 }
  0x63   : > { %p619_p11 = pnand %p618_p12, %p612_p4 }
  0x65   : > { %622 = shalt.err (!%p619_p11)
}
  0x66   : > { %468 = dma.hbm_to_vmem [thread:$0]  (!%p879_p1), %s1005_s0, 640, %s874_s10, [#allocation4], %s1023_s9, %s1023_s9, %s713_s28  }
  0x67   : > { %p1024_p9 = scmp.ne.s32.totalorder %s1021_s8, 0 }
  0x68   : > { %p1025_p6 = scmp.eq.s32.totalorder (!%p1024_p9), %s835_s30, 0 }
  0x69   : > { %212 = sbr.rel (%p1024_p9) target bundleno = 149 (0x95), region = 32 }
  0x70   : > { %676 = dma.done.wait (%p1025_p6), [#allocation4], 640   ;;  %p1026_p8 = pmov %p1025_p6 }
  0x71   : > { %s218_s22 = sand.u32 1, %s835_s30   ;;  %s944_s6 = sand.u32 1, %s693_s13  }
  0x72   : > { %678 = vsyncadd (%p1026_p8), [#allocation4], 4294966656  ;;  %s454_s27 = smul.u32 40, %s944_s6  ;;  %s219_s19 = scalar_lea.sflag [#allocation7], %s218_s22 }
  0x73   : > { %p1027_p1 = scmp.ne.s32.totalorder %s1018_s7, 0 }
  0x74   : > { %s222_s24 = scalar_lea.vmem [#allocation6], %s454_s27 }
  0x75   : > { %680 = dma.done.wait (%p1027_p1), %s219_s19, 1280  }
  0x76   : > { %682 = vsyncadd (%p1027_p1), %s219_s19, 4294966016  ;;  %v268_v0 = vld [vmem:[%s222_s24] sm:$0xff]  ;;  %v269_v1 = vld [vmem:[%s222_s24 + $0x8] sm:$0xff]  ;;  %s231_s28 = scalar_lea.vmem [#allocation8], %s454_s27  ;;  %s445_s30 = sshll.u32 %s944_s6, 3 }
  0x77   : > { %v270_v2 = vld [vmem:[%s222_s24 + $0x10] sm:$0xff]  ;;  %v271_v3 = vld [vmem:[%s222_s24 + $0x18] sm:$0xff]  ;;  %v272_v4 = vld [vmem:[%s222_s24 + $0x20] sm:$0xff]  ;;  %s258_s7 = scalar_lea.vmem [#allocation9], %s445_s30  ;;  %s447_s10 = sshll.u32 %s701_s15, 7 }
  0x78   : > { %v273_v5 = vld [vmem:[%s231_s28] sm:$0xff]  ;;  %v274_v6 = vld [vmem:[%s231_s28 + $0x8] sm:$0xff]  ;;  %v275_v7 = vld [vmem:[%s231_s28 + $0x10] sm:$0xff]  ;;  %s324_s8 = sshll.u32 %s258_s7, 4  ;;  %s958_s11 = scalar_lea.hbm %s1008_s3, %s447_s10  ;;  %s953_s8 = int_to_ptr.vmem [resolvable:$true] %s324_s8 }
  0x79   : > { %v276_v8 = vld [vmem:[%s231_s28 + $0x18] sm:$0xff]  ;;  %v278_v9 = vsub.f32 %v268_v0, %v273_v5  ;;  %v277_v10 = vld [vmem:[%s231_s28 + $0x20] sm:$0xff]  ;;  %v279_v11 = vsub.f32 %v269_v1, %v274_v6  ;;  %v280_v12 = vsub.f32 %v270_v2, %v275_v7  ;;  %v289_v17 = vld [vmem:[#allocation3 + $0x8] sm:$0xff]  ;;  %s311_s26 = scalar_lea.sflag [#allocation5], %s944_s6  ;;  %s623_s21 = scalar_lea.vmem %s953_s8, 128 }
  0x7a   : > { %v281_v13 = vsub.f32 %v271_v3, %v276_v8  ;;  %v288_v14 = vld [vmem:[#allocation3] sm:$0xff]  ;;  %v282_v15 = vsub.f32 %v272_v4, %v277_v10  ;;  %v290_v18 = vld [vmem:[#allocation3 + $0x10] sm:$0xff]  ;;  %v291_v22 = vld [vmem:[#allocation3 + $0x18] sm:$0xff]  ;;  %p624_p10 = scmp.ne.s32.totalorder %s953_s8, %s623_s21  ;;  %p1028_p13 = scmp.ne.s32.totalorder %s1019_s29, 0 }
  0x7b   : > { %v283_v16 = vmul.f32 %v278_v9, %v278_v9  ;;  %v284_v19 = vmul.f32 %v279_v11, %v279_v11  ;;  %v285_v20 = vmul.f32 %v280_v12, %v280_v12  ;;  %v292_v27 = vld [vmem:[#allocation3 + $0x20] sm:$0xff]  ;;  %s716_s15 = smov [#allocation9]  }
  0x7c   : > { %v286_v21 = vmul.f32 %v281_v13, %v281_v13  ;;  %v287_v24 = vmul.f32 %v282_v15, %v282_v15  ;;  %p625_p3 = pnand %p624_p10, %p1028_p13  ;;  %s627_s5 = sshll.u32 %s716_s15, 4  ;;  %s628_s5 = int_to_ptr.vmem [resolvable:$false] %s627_s5 }
  0x7d   : > { %v293_v23 = vmul.f32 %v288_v14, %v283_v16  ;;  %v294_v25 = vmul.f32 %v289_v17, %v284_v19  ;;  %v295_v26 = vmul.f32 %v290_v18, %v285_v20  ;;  %s629_s1 = scalar_lea.vmem %s628_s5, 256  ;;  %p630_p0 = scmp.lt.s32.totalorder %s953_s8, %s628_s5 }
  0x7e   : > { %v296_v28 = vmul.f32 %v291_v22, %v286_v21  ;;  %v297_v30 = vmul.f32 %v292_v27, %v287_v24  ;;  %p626_p7 = pneg %p625_p3  ;;  %p631_p4 = scmp.lt.s32.totalorder %s629_s1, %s623_s21 }
  0x7f   : > { %v299_v29 = vadd.f32 %v294_v25, %v293_v23 }
  0x80   : > { %p632_p2 = por %p631_p4, %p630_p0 }
  0x81   : > { %v300_v31 = vadd.f32 %v299_v29, %v295_v26 }
  0x82   : > { %p633_p5 = pnand %p632_p2, %p626_p7 }
  0x83   : > { %v301_v32 = vadd.f32 %v300_v31, %v296_v28 }
  0x85   : > { %v302_v33 = vadd.f32 %v301_v32, %v297_v30 }
  0x87   : > { %309 = vst [vmem:[%s258_s7] sm:$0xff] %v302_v33 }
  0x88   : > { %636 = shalt.err (!%p633_p5)
}
  0x89   : > { %s637_s20 = scalar_lea.hbm %s958_s11, 128  ;;  %s641_s27 = scalar_lea.hbm %s1008_s3, 256 }
  0x8a   : > { %p638_p12 = scmp.ne.s32.totalorder %s958_s11, %s637_s20  ;;  %p642_p6 = scmp.lt.u32.totalorder %s958_s11, %s1008_s3 }
  0x8b   : > { %p643_p8 = scmp.lt.u32.totalorder %s641_s27, %s637_s20  ;;  %p645_p10 = scmp.lt.u32.totalorder %s637_s20, %s958_s11 }
  0x8c   : > { %p639_p11 = pnand %p638_p12, %p1028_p13 }
  0x8d   : > { %p644_p1 = por %p643_p8, %p642_p6 }
  0x8e   : > { %p640_p9 = pneg %p639_p11 }
  0x8f   : > { %p646_p3 = por %p645_p10, %p644_p1 }
  0x91   : > { %p647_p7 = pnand %p646_p3, %p640_p9 }
  0x93   : > { %650 = shalt.err (!%p647_p7)
}
  0x94   : > { %463 = dma.vmem_to_hbm [thread:$0]  (%p1028_p13), %s953_s8, 128, %s958_s11, %s311_s26  }
  0x95 PF: > { %s336_s28 = sand.u32 1, %s689_s12   ;;  %p1029_p0 = scmp.ne.s32.totalorder %s1020_s4, 0 }
  0x96   : > { %p1030_p4 = scmp.ge.s32.totalorder %s709_s17, 2  ;;  %s337_s30 = scalar_lea.sflag [#allocation5], %s336_s28 }
  0x98   : > { %p477_p2 = pnand %p1030_p4, %p1029_p0 }
  0x9a   : > { %684 = dma.done.wait (!%p477_p2), %s337_s30, 128  }
  0x9b   : > { %686 = vsyncadd (!%p477_p2), %s337_s30, 4294967168  ;;  %s20_s17 = sadd.s32 1, %s709_s17   ;;  %s1031_s12 = smov %s693_s13 }
  0x9c   : > { %p17_p5 = scmp.ge.s32.totalorder %s20_s17, 4   ;;  %s1032_s13 = smov %s697_s14 }
  0x9d   : > { %s1033_s14 = smov %s784_s23  ;;  %s1034_s15 = smov %s705_s16 }
  0x9e   : > { %s1035_s16 = smov %s1037_s18  ;;  %19 = sbr.rel (!%p17_p5) target bundleno = 9 (0x9), region = 101 }
  0xa5   :  { %342 = vsyncpa [#allocation4], 1 }
  0xa6   :  { %344 = vsyncpa [#allocation4 + $0x1], 1 }
  0xa7   :  { %345 = vsyncpa [#allocation7], 1 }
  0xa8   :  { %347 = vsyncpa [#allocation7 + $0x1], 1 }
  0xa9   :  { %348 = vsyncpa [#allocation5], 1 }
  0xaa   :  { %350 = vsyncpa [#allocation5 + $0x1], 1 }

</bundles_post_ra>
